<compile_context>
chip_gen: v7x
topology: tpu7x:2x2x1
jax: 0.10.0
libtpu: 0.0.40
codegen_flags: <defaults>
</compile_context>

<pallas_src>
import math

import jax
import jax.numpy as jnp
from jax import lax
from jax.experimental import pallas as pl
from jax.experimental.pallas import tpu as pltpu


# --- static problem sizes (from the module) ---------------------------------
D, H, H2 = 3, 32, 32          # linear1: 3->32, linear2: 32->32 (see note above)

# Packed-parameter layout (built once at init, never per-call):
#   rows [0, D)               : w1  (D, H)    linear1 weight (x @ w layout)
#   row  D                    : b1  (H,)      linear1 bias
#   rows [W2_ROW, W2_ROW + H) : w2  (H, H2)   linear2 weight   (8-aligned slice)
#   row  W2_ROW + H           : b2  (H2,)     linear2 bias     (8-aligned start)
W2_ROW = 8
PACK_ROWS = W2_ROW + H + 1    # 41 (VMEM pads to 48 sublanes internally)


def _mlp_attn_kernel(x1_ref, x2_ref, wpack_ref, out_ref):
    """Grid-less single-shot kernel; every operand is whole-array resident in VMEM.

    x1_ref: (N, D)   x2_ref: (M, D)   wpack_ref: (PACK_ROWS, H)   out_ref: (N, M)
    """
    w1 = wpack_ref[0:D, :]                          # (D, H)   within first 8-row tile
    b1 = wpack_ref[D:D + 1, :]                      # (1, H)
    w2 = wpack_ref[W2_ROW:W2_ROW + H, :]            # (H, H2)  8-aligned free view
    b2 = wpack_ref[W2_ROW + H:W2_ROW + H + 1, :]    # (1, H2)  8-aligned start

    # v1 = linear1(x1); v4 = linear1(x2)
    # (K = 3 contraction; a 3-FMA VPU expansion would shave tens of ns on v5e,
    #  but the call is launch-latency bound, so the MXU dot is kept for clarity.)
    v1 = jnp.dot(x1_ref[...], w1, preferred_element_type=jnp.float32) + b1
    v4 = jnp.dot(x2_ref[...], w1, preferred_element_type=jnp.float32) + b1

    # v2 = linear2(v1); v3 = dropout(v2)
    # TODO(synk): dropout is eval-mode identity; training mode would need
    # pltpu.prng_seed + pltpu.prng_random_bits keep-mask scaled by 1/(1-p).
    v3 = jnp.dot(v1, w2, preferred_element_type=jnp.float32) + b2

    # v6 = v3 @ v4.T — contract the last dims directly on the MXU; no explicit
    # XLU transpose, no (H, M) intermediate, exact (N, M) store.
    out_ref[...] = lax.dot_general(
        v3, v4,
        dimension_numbers=(((1,), (1,)), ((), ())),
        preferred_element_type=jnp.float32,
    )


def pack_params(w1, b1, w2, b2):
    """One-time packing of linear1/linear2 params into a single kernel operand."""
    wpack = jnp.zeros((PACK_ROWS, H), jnp.float32)
    wpack = wpack.at[0:D, :].set(w1)
    wpack = wpack.at[D, :].set(b1.reshape(H))
    wpack = wpack.at[W2_ROW:W2_ROW + H, :].set(w2)
    wpack = wpack.at[W2_ROW + H, :].set(b2.reshape(H2))
    return wpack


def model_forward(x1, x2, wpack):
    n, _ = x1.shape
    m, _ = x2.shape
    vmem = pl.BlockSpec(memory_space=pltpu.MemorySpace.VMEM)
    return pl.pallas_call(
        _mlp_attn_kernel,
        out_shape=jax.ShapeDtypeStruct((n, m), jnp.float32),
        in_specs=[vmem, vmem, vmem],
        out_specs=vmem,
    )(x1, x2, wpack)


def _torch_linear_init(key, fan_in, fan_out):
    """Deterministic init mimicking torch.nn.Linear (uniform +/- 1/sqrt(fan_in))."""
    kw, kb = jax.random.split(key)
    bound = 1.0 / math.sqrt(fan_in)
    w = jax.random.uniform(kw, (fan_in, fan_out), jnp.float32, -bound, bound)
    b = jax.random.uniform(kb, (1, fan_out), jnp.float32, -bound, bound)
    return w, b


if __name__ == "__main__":
    N, M = 10, 10

    root = jax.random.PRNGKey(0)
    k_x1, k_x2, k_l1, k_l2 = jax.random.split(root, 4)

    x1 = jax.random.normal(k_x1, (N, D), jnp.float32)
    x2 = jax.random.normal(k_x2, (M, D), jnp.float32)
    w1, b1 = _torch_linear_init(k_l1, D, H)
    w2, b2 = _torch_linear_init(k_l2, H, H2)

    wpack = pack_params(w1, b1, w2, b2)          # init-time, not per-call

    out = model_forward(x1, x2, wpack)
    out = jax.block_until_ready(out)

    # Pure-JAX reference for correctness.
    v1 = x1 @ w1 + b1
    v3 = v1 @ w2 + b2            # dropout == identity (eval mode)
    v4 = x2 @ w1 + b1
    ref = v3 @ v4.T
    assert out.shape == (N, M)
    assert jnp.allclose(out, ref, atol=1e-5, rtol=1e-5), "mismatch vs JAX reference"

    print("KERNEL_OK")
</pallas_src>

<mosaic_0001>
module attributes {stable_mosaic.version = 11 : i64} {
  func.func @_mlp_attn_kernel(%arg0: memref<10x3xf32, #tpu.memory_space<vmem>>, %arg1: memref<10x3xf32, #tpu.memory_space<vmem>>, %arg2: memref<41x32xf32, #tpu.memory_space<vmem>>, %arg3: memref<10x10xf32, #tpu.memory_space<vmem>>) attributes {dimension_semantics = [], scalar_prefetch = 0 : i64, scratch_operands = 0 : i64, tpu.core_type = #tpu.core_type<tc>} {
    %c0 = arith.constant 0 : index
    %c0_0 = arith.constant 0 : index
    %0 = vector.load %arg2[%c0, %c0_0] : memref<41x32xf32, #tpu.memory_space<vmem>>, vector<3x32xf32>
    %c3 = arith.constant 3 : index
    %c0_1 = arith.constant 0 : index
    %1 = vector.load %arg2[%c3, %c0_1] : memref<41x32xf32, #tpu.memory_space<vmem>>, vector<1x32xf32>
    %c8 = arith.constant 8 : index
    %c0_2 = arith.constant 0 : index
    %2 = vector.load %arg2[%c8, %c0_2] : memref<41x32xf32, #tpu.memory_space<vmem>>, vector<32x32xf32>
    %c40 = arith.constant 40 : index
    %c0_3 = arith.constant 0 : index
    %3 = vector.load %arg2[%c40, %c0_3] : memref<41x32xf32, #tpu.memory_space<vmem>>, vector<1x32xf32>
    %c0_4 = arith.constant 0 : index
    %c0_5 = arith.constant 0 : index
    %4 = vector.load %arg0[%c0_4, %c0_5] : memref<10x3xf32, #tpu.memory_space<vmem>>, vector<10x3xf32>
    %cst = arith.constant dense<0.000000e+00> : vector<10x32xf32>
    %5 = tpu.matmul %4, %0, %cst {dimension_numbers = #tpu.dot_dimension_numbers<[1], [0], [0], [1], [0, 0, 1, 1], [], []>} : vector<10x3xf32>, vector<3x32xf32>, vector<10x32xf32> -> vector<10x32xf32>
    %6 = vector.broadcast %1 : vector<1x32xf32> to vector<10x32xf32>
    %7 = arith.addf %5, %6 : vector<10x32xf32>
    %c0_6 = arith.constant 0 : index
    %c0_7 = arith.constant 0 : index
    %8 = vector.load %arg1[%c0_6, %c0_7] : memref<10x3xf32, #tpu.memory_space<vmem>>, vector<10x3xf32>
    %cst_8 = arith.constant dense<0.000000e+00> : vector<10x32xf32>
    %9 = tpu.matmul %8, %0, %cst_8 {dimension_numbers = #tpu.dot_dimension_numbers<[1], [0], [0], [1], [0, 0, 1, 1], [], []>} : vector<10x3xf32>, vector<3x32xf32>, vector<10x32xf32> -> vector<10x32xf32>
    %10 = vector.broadcast %1 : vector<1x32xf32> to vector<10x32xf32>
    %11 = arith.addf %9, %10 : vector<10x32xf32>
    %cst_9 = arith.constant dense<0.000000e+00> : vector<10x32xf32>
    %12 = tpu.matmul %7, %2, %cst_9 {dimension_numbers = #tpu.dot_dimension_numbers<[1], [0], [0], [1], [0, 0, 1, 1], [], []>} : vector<10x32xf32>, vector<32x32xf32>, vector<10x32xf32> -> vector<10x32xf32>
    %13 = vector.broadcast %3 : vector<1x32xf32> to vector<10x32xf32>
    %14 = arith.addf %12, %13 : vector<10x32xf32>
    %cst_10 = arith.constant dense<0.000000e+00> : vector<10x10xf32>
    %15 = tpu.matmul %14, %11, %cst_10 {dimension_numbers = #tpu.dot_dimension_numbers<[1], [1], [0], [0], [0, 0, 1, 0], [], []>} : vector<10x32xf32>, vector<10x32xf32>, vector<10x10xf32> -> vector<10x10xf32>
    %c0_11 = arith.constant 0 : index
    %c0_12 = arith.constant 0 : index
    %16 = vector.load %arg3[%c0_11, %c0_12] : memref<10x10xf32, #tpu.memory_space<vmem>>, vector<10x10xf32>
    tpu.vector_store %arg3[%c0_11, %c0_12], %15 {strides = array<i32>} : memref<10x10xf32, #tpu.memory_space<vmem>>, vector<10x10xf32>,
    return
  }
}

</mosaic_0001>

<bundles_post_ra>
// kernel: tpu_custom_call.1
= control target key start
LH: loop header
LB: loop body
LE: loop exit
PB: predicated region body
PF: predicated region fallthrough
CT: control target
= control target key end

     0   :  { %vm35_vm0 = vcmask 1042432   ;;  %vm28_vm1 = vcmask 23552   ;;  %s563_s0 = inlined_call_operand.vmem [shape: f32[10,3], index: 0, kind: input, shape index: {}]   ;;  %s564_s1 = inlined_call_operand.vmem [shape: f32[10,3], index: 1, kind: input, shape index: {}]   ;;  %s565_s2 = inlined_call_operand.vmem [shape: f32[41,32], index: 2, kind: input, shape index: {}]   ;;  %s566_s3 = inlined_call_operand.hbm [shape: f32[10,10], index: 3, kind: output, shape index: {}]  }
   0x1   :  { %v15_v0 = vld [vmem:[%s565_s2] sm:$0x7]  ;;  %v23_v2 = vld [vmem:[%s563_s0 + $0x8] sm:$0x3]  ;;  %v18_v6 = vld [vmem:[%s565_s2 + $0x10] sm:$0xff] }
   0x2   :  { %v22_v1 = vld [vmem:[%s563_s0] sm:$0xff]  ;;  %420 = vmatprep.subr.msk.mxu0 %vm35_vm0, %v15_v0  ;;  %v17_v4 = vld [vmem:[%s565_s2 + $0x8] sm:$0xff]  ;;  %425 = vmatprep.subr.msk.mxu1 %vm35_vm0, %v15_v0 }
   0x3   :  { %422 = vmatprep.mubr.msk.f32.mxu0 %vm28_vm1, %v22_v1  ;;  %v114_v3 = vld [vmem:[%s564_s1] sm:$0xff]  ;;  %421 = vmatpush3.msk.msra.mxu0 %vm35_vm0, %v15_v0  ;;  %v115_v5 = vld [vmem:[%s564_s1 + $0x8] sm:$0x3] }
   0x4   :  { %8 = vsyncpa [#allocation3], 0  ;;  %423 = vmatmul.mubr.msk.f32.vlgmr.msra.gmra.mrb[0].mxu0 %vm28_vm1, %v23_v2  ;;  %426 = vmatpush3.msk.msra.mxu1 %vm35_vm0, %v15_v0  ;;  %v448_v7 = vpack.c.bf16 %v18_v6, %v17_v4  ;;  %v19_v8 = vld [vmem:[%s565_s2 + $0x18] sm:$0xff]  ;;  %v20_v9 = vld [vmem:[%s565_s2 + $0x20] sm:$0xff]  ;;  %vm201_vm2 = vcmask 261120   ;;  %s489_s5 = smov [#allocation2]  }
   0x5   :  { %427 = vmatprep.mubr.msk.f32.mxu1 %vm28_vm1, %v114_v3  ;;  %v452_v10 = vpack.c.bf16 %v20_v9, %v19_v8  ;;  %v390_v11 = vld [vmem:[%s565_s2 + $0x3] ss:$0 sm:$0xff]  ;;  %vm457_vm3 = vmpackc.low %vm201_vm2, %vm201_vm2  ;;  %v397_v21 = vld [vmem:[%s565_s2 + $0x28] ss:$0 sm:$0xff]  ;;  %s379_s6 = sshll.u32 %s489_s5, 4  ;;  %vm372_vm4 = vcmask 74752   ;;  %s380_s6 = int_to_ptr.vmem [resolvable:$true] %s379_s6 }
   0x6   :  { %428 = vmatmul.mubr.msk.f32.vlgmr.msra.gmra.mrb[0].mxu1 %vm28_vm1, %v115_v5  ;;  %449 = vmatprep.subr.bf16.mxu0 %v448_v7  ;;  %vm370_vm5 = vcmask 80896   ;;  %s465_s7 = scalar_lea.vmem %s380_s6, 256  ;;  %p470_p1 = scmp.lt.s32.totalorder %s380_s6, %s380_s6 }
   0x7   :  { %451 = vmatpush3.bf16.msra.mxu0 %v448_v7  ;;  %p466_p0 = scmp.ne.s32.totalorder %s380_s6, %s465_s7  ;;  %p471_p2 = scmp.lt.s32.totalorder %s465_s7, %s465_s7 }
   0x8   :  { %453 = vmatprep.subr.bf16.mxu0 %v452_v10 }
   0x9   :  { %p472_p3 = por %p471_p2, %p470_p1 }
   0xb   :  { %455 = vmatpush3.bf16.msra.mxu0 %v452_v10  ;;  %p473_p4 = pnand %p472_p3, %p466_p0 }
  0xd7   :  { %v424_v12 = vpop.f32.mrb[0].mxu0 }
  0xd8   :  { %v105_v13 = vpop.f32.mrb[1].mxu0  ;;  %v111_v16 = vadd.f32 %v424_v12, %v390_v11 }
  0xd9   :  { %v106_v14 = vadd.f32 %v390_v11, %v105_v13  ;;  %v429_v15 = vpop.f32.mrb[0].mxu1 }
  0xda   :  { %v194_v17 = vadd.f32 %v429_v15, %v390_v11  ;;  %v188_v18 = vpop.f32.mrb[1].mxu1 }
  0xdb   :  { %438 = vmatprep.mubr.msk.f32.mxu0 %vm201_vm2, %v106_v14  ;;  %v189_v19 = vadd.f32 %v390_v11, %v188_v18 }
  0xdc   :  { %439 = vmatmul.mubr.msk.f32.vlgmr.msra.gmra.mrb[2].mxu0 %vm201_vm2, %v111_v16 }
  0xdd   :  { %v456_v20 = vpack.c.bf16 %v194_v17, %v189_v19 }
  0xdf   :  { %458 = vmatprep.subr.msk.bf16.mxu1 %vm457_vm3, %v456_v20 }
  0xe0   :  { %461 = vmatpush3.bf16.xpose.msk.msra.mxu1 %vm457_vm3, %v456_v20 }
 0x1af   :  { %v440_v22 = vpop.f32.mrb[2].mxu0 }
 0x1b0   :  { %v274_v23 = vpop.f32.mrb[3].mxu0  ;;  %v280_v25 = vadd.f32 %v440_v22, %v397_v21 }
 0x1b1   :  { %v275_v24 = vadd.f32 %v397_v21, %v274_v23 }
 0x1b3   :  { %445 = vmatprep.mubr.msk.f32.mxu1 %vm201_vm2, %v275_v24 }
 0x1b4   :  { %446 = vmatmul.mubr.msk.f32.vlgmr.msra.gmra.mrb[2].mxu1 %vm201_vm2, %v280_v25 }
 0x287   :  { %v447_v26 = vpop.f32.mrb[2].mxu1 }
 0x288   :  { %373 = vst.msk [vmem:[#allocation2 + $0x8] sm:$0x3] %vm372_vm4, %v447_v26  ;;  %v361_v27 = vpop.f32.mrb[3].mxu1 }
 0x289   :  { %371 = vst.msk [vmem:[#allocation2] sm:$0xff] %vm370_vm5, %v361_v27 }
 0x28a   :  { %476 = shalt.err (!%p473_p4)
}
 0x28b   :  { %s477_s9 = scalar_lea.hbm %s566_s3, 256 }
 0x28c   :  { %p478_p5 = scmp.ne.s32.totalorder %s566_s3, %s477_s9  ;;  %p481_p6 = scmp.lt.u32.totalorder %s477_s9, %s566_s3 }
 0x28e   :  { %p483_p7 = pnand %p481_p6, %p478_p5 }
 0x290   :  { %486 = shalt.err (!%p483_p7)
}
 0x291   :  { %s490_s14 = smov 128   ;;  %s491_s15 = smov 8  }
 0x292   :  { %385 = dma.vmem_to_hbm [thread:$0]  %s380_s6, 256, %s566_s3, [#allocation3], %s490_s14, %s490_s14, %s491_s15  }
 0x293   :  { %487 = dma.done.wait [#allocation3], 256  }
 0x294   :  { %488 = vsyncadd [#allocation3], 4294967040 }
 0x295   :  { %389 = vsyncpa [#allocation3], 1 }

</bundles_post_ra>
